<compile_context>
chip_gen: v5e
topology: v5e:2x2
jax: 0.10.0
libtpu: 0.0.40
codegen_flags: <defaults>
</compile_context>

<pallas_src>
import jax
import jax.numpy as jnp
from jax import lax
from jax.experimental import pallas as pl
from jax.experimental.pallas import tpu as pltpu


def _linear_kernel(x_ref, w_ref, b_ref, o_ref):
    # x_ref: (TM, D_in), w_ref: (D_out, D_in) [PyTorch layout], b_ref: (1, D_out)
    # Contract dim 1 of both operands -> (TM, D_out); f32 accumulation on the MXU.
    acc = lax.dot_general(
        x_ref[...], w_ref[...],
        dimension_numbers=(((1,), (1,)), ((), ())),
        preferred_element_type=jnp.float32,
    )
    # Bias add in f32 on the VPU (no bf16 elementwise anywhere -> safe on v5e too).
    o_ref[...] = (acc + b_ref[...]).astype(o_ref.dtype)


def logistic_regression_forward(x, weight, bias, *, block_m=512, use_bf16_inputs=False):
    """x: (B, D_in); weight: (D_out, D_in) [PyTorch layout]; bias: (D_out,)."""
    B, D_in = x.shape
    D_out = weight.shape[0]
    out_dtype = x.dtype

    if use_bf16_inputs:
        # Halves the dominant x HBM traffic on v6e/v7x; accumulation stays f32.
        x = x.astype(jnp.bfloat16)
        weight = weight.astype(jnp.bfloat16)

    bias2 = bias.astype(jnp.float32).reshape(1, D_out)  # 2-D for TPU broadcast

    # Batch tiling: TM multiple of 8 (sublane) when tiled, or the full B when small.
    if B <= block_m:
        tm = B
    else:
        tm = block_m
    grid_m = pl.cdiv(B, tm)

    cost = pl.CostEstimate(
        flops=2 * B * D_in * D_out,
        transcendentals=0,
        bytes_accessed=(x.size * x.dtype.itemsize
                        + weight.size * weight.dtype.itemsize
                        + bias2.size * bias2.dtype.itemsize
                        + B * D_out * jnp.dtype(out_dtype).itemsize),
    )

    return pl.pallas_call(
        _linear_kernel,
        out_shape=jax.ShapeDtypeStruct((B, D_out), out_dtype),
        grid_spec=pltpu.PrefetchScalarGridSpec(
            num_scalar_prefetch=0,
            grid=(grid_m,),
            in_specs=[
                pl.BlockSpec((tm, D_in), lambda i: (i, 0)),        # x tile, pipelined
                pl.BlockSpec((D_out, D_in), lambda i: (0, 0)),     # weight resident
                pl.BlockSpec((1, D_out), lambda i: (0, 0)),        # bias resident
            ],
            out_specs=pl.BlockSpec((tm, D_out), lambda i: (i, 0)),
        ),
        compiler_params=pltpu.CompilerParams(
            dimension_semantics=("parallel",),   # independent rows -> 2 TCs on v7x
        ),
        cost_estimate=cost,
    )(x, weight, bias2)


if __name__ == "__main__":
    # Small shapes consistent with the module: batch=8, input_dim=32, low_rank=16.
    B, D_in, D_out = 8, 32, 16

    key = jax.random.PRNGKey(0)
    kx, kw, kb, kx2 = jax.random.split(key, 4)

    # Deterministic parameter init mimicking torch.nn.Linear (U(-1/sqrt(in), 1/sqrt(in))).
    bound = 1.0 / (D_in ** 0.5)
    weight = jax.random.uniform(kw, (D_out, D_in), jnp.float32, -bound, bound)
    bias = jax.random.uniform(kb, (D_out,), jnp.float32, -bound, bound)
    x = jax.random.normal(kx, (B, D_in), jnp.float32)

    # --- f32 path (strict correctness check) ---
    out = logistic_regression_forward(x, weight, bias)
    jax.block_until_ready(out)
    ref = x @ weight.T + bias
    assert out.shape == (B, D_out)
    assert jnp.allclose(out, ref, atol=1e-5, rtol=1e-5)

    # --- tiled + bf16-operand path (exercises grid>1, pipelining, parallel axis) ---
    B2 = 1024
    x2 = jax.random.normal(kx2, (B2, D_in), jnp.float32)
    out2 = logistic_regression_forward(x2, weight, bias, block_m=512, use_bf16_inputs=True)
    jax.block_until_ready(out2)
    ref2 = x2 @ weight.T + bias
    assert out2.shape == (B2, D_out)
    assert jnp.allclose(out2, ref2, atol=2e-2, rtol=2e-2)

    print("KERNEL_OK")
</pallas_src>

<mosaic_0001>
module attributes {stable_mosaic.version = 11 : i64} {
  func.func @_linear_kernel(%arg0: i32, %arg1: memref<8x32xf32, #tpu.memory_space<vmem>>, %arg2: memref<16x32xf32, #tpu.memory_space<vmem>>, %arg3: memref<1x16xf32, #tpu.memory_space<vmem>>, %arg4: memref<8x16xf32, #tpu.memory_space<vmem>>) attributes {dimension_semantics = [#tpu.dimension_semantics<parallel>], iteration_bounds = array<i64: 1>, scalar_prefetch = 0 : i64, scratch_operands = 0 : i64, tpu.core_type = #tpu.core_type<tc>, window_params = [{transform_indices = @transform_0, window_bounds = array<i64: 8, 32>}, {pipeline_mode = #tpu.pipeline_mode<synchronous>, transform_indices = @transform_1, window_bounds = array<i64: 16, 32>}, {pipeline_mode = #tpu.pipeline_mode<synchronous>, transform_indices = @transform_2, window_bounds = array<i64: 1, 16>}, {transform_indices = @transform_3, window_bounds = array<i64: 8, 16>}]} {
    %c0 = arith.constant 0 : index
    %c0_0 = arith.constant 0 : index
    %0 = vector.load %arg1[%c0, %c0_0] : memref<8x32xf32, #tpu.memory_space<vmem>>, vector<8x32xf32>
    %c0_1 = arith.constant 0 : index
    %c0_2 = arith.constant 0 : index
    %1 = vector.load %arg2[%c0_1, %c0_2] : memref<16x32xf32, #tpu.memory_space<vmem>>, vector<16x32xf32>
    %cst = arith.constant dense<0.000000e+00> : vector<8x16xf32>
    %2 = tpu.matmul %0, %1, %cst {dimension_numbers = #tpu.dot_dimension_numbers<[1], [1], [0], [0], [0, 0, 1, 0], [], []>} : vector<8x32xf32>, vector<16x32xf32>, vector<8x16xf32> -> vector<8x16xf32>
    %c0_3 = arith.constant 0 : index
    %c0_4 = arith.constant 0 : index
    %3 = vector.load %arg3[%c0_3, %c0_4] : memref<1x16xf32, #tpu.memory_space<vmem>>, vector<1x16xf32>
    %4 = vector.broadcast %3 : vector<1x16xf32> to vector<8x16xf32>
    %5 = arith.addf %2, %4 : vector<8x16xf32>
    %c0_5 = arith.constant 0 : index
    %c0_6 = arith.constant 0 : index
    %6 = vector.load %arg4[%c0_5, %c0_6] : memref<8x16xf32, #tpu.memory_space<vmem>>, vector<8x16xf32>
    tpu.vector_store %arg4[%c0_5, %c0_6], %5 {strides = array<i32>} : memref<8x16xf32, #tpu.memory_space<vmem>>, vector<8x16xf32>,
    return
  }
  func.func @transform_0(%arg0: i32) -> (i32, i32) {
    %c0_i32 = arith.constant 0 : i32
    %c0_i32_0 = arith.constant 0 : i32
    return %arg0, %c0_i32 : i32, i32
  }
  func.func @transform_1(%arg0: i32) -> (i32, i32) {
    %c0_i32 = arith.constant 0 : i32
    %c0_i32_0 = arith.constant 0 : i32
    %c0_i32_1 = arith.constant 0 : i32
    return %c0_i32, %c0_i32_0 : i32, i32
  }
  func.func @transform_2(%arg0: i32) -> (i32, i32) {
    %c0_i32 = arith.constant 0 : i32
    %c0_i32_0 = arith.constant 0 : i32
    %c0_i32_1 = arith.constant 0 : i32
    return %c0_i32, %c0_i32_0 : i32, i32
  }
  func.func @transform_3(%arg0: i32) -> (i32, i32) {
    %c0_i32 = arith.constant 0 : i32
    %c0_i32_0 = arith.constant 0 : i32
    return %arg0, %c0_i32 : i32, i32
  }
}

</mosaic_0001>

<bundles_post_ra>
// kernel: tpu_custom_call.1
= control target key start
LH: loop header
LB: loop body
LE: loop exit
PB: predicated region body
PF: predicated region fallthrough
CT: control target
= control target key end

     0   :  { %8 = vsyncpa [#allocation3], 0  ;;  %s226_s0 = inlined_call_operand.hbm [shape: f32[8,32], index: 0, kind: input, shape index: {}]   ;;  %s227_s1 = inlined_call_operand.hbm [shape: f32[16,32], index: 1, kind: input, shape index: {}]   ;;  %s228_s2 = inlined_call_operand.vmem [shape: f32[1,16], index: 2, kind: input, shape index: {}]   ;;  %s229_s3 = inlined_call_operand.hbm [shape: f32[8,16], index: 3, kind: output, shape index: {}]  }
   0x1   :  { %9 = vsyncpa [#allocation6], 0 }
   0x2   :  { %10 = vsyncpa [#allocation4], 0  ;;  %s16_s14 = sshll.u32 %s226_s0, 4  ;;  %s189_s15 = smov [#allocation2]   ;;  %s17_s14 = int_to_ptr.hbm [resolvable:$true] %s16_s14 }
   0x3   :  { %s18_s16 = sshll.u32 %s189_s15, 4  ;;  %s26_s19 = sshll.u32 %s227_s1, 4  ;;  %s19_s16 = int_to_ptr.vmem [resolvable:$true] %s18_s16  ;;  %s27_s19 = int_to_ptr.hbm [resolvable:$true] %s26_s19 }
   0x4   :  { %21 = dma.hbm_to_vmem [thread:$0]  %s17_s14, 128, %s19_s16, [#allocation3]  }
   0x5   :  { %s190_s20 = smov [#allocation5]   ;;  %s191_s22 = smov 128  }
   0x6   :  { %s28_s21 = sshll.u32 %s190_s20, 4  ;;  %s192_s23 = smov 8   ;;  %s29_s21 = int_to_ptr.vmem [resolvable:$true] %s28_s21 }
   0x7   :  { %34 = dma.hbm_to_vmem [thread:$0]  %s27_s19, 256, %s29_s21, [#allocation6], %s191_s22, %s191_s22, %s192_s23  }
   0x8   :  { %183 = dma.done.wait [#allocation3], 128  }
   0x9   :  { %184 = vsyncadd [#allocation3], 4294967168 }
   0xa   :  { %185 = dma.done.wait [#allocation6], 256  }
   0xb   :  { %186 = vsyncadd [#allocation6], 4294967040  ;;  %vm52_vm0 = vcmask 261120   ;;  %v47_v0 = vld [vmem:[#allocation5 + $0x8] sm:$0xff]  ;;  %v46_v1 = vld [vmem:[#allocation5] sm:$0xff]  ;;  %s193_s24 = smov [#allocation7]  }
   0xc   :  { %102 = vmatpush.xpose.msk.msra.mxu0 %vm52_vm0, %v47_v0  ;;  %v45_v2 = vld [vmem:[#allocation2] sm:$0xff]  ;;  %s89_s25 = sshll.u32 %s193_s24, 4  ;;  %s91_s28 = sshll.u32 %s229_s3, 4  ;;  %vm82_vm1 = vcmask 130048   ;;  %s90_s25 = int_to_ptr.vmem [resolvable:$true] %s89_s25  ;;  %s92_s28 = int_to_ptr.hbm [resolvable:$true] %s91_s28 }
   0xd   :  { %v110_v3 = vld [vmem:[%s228_s2] ss:$0 sm:$0xff] }
  0x10   :  { %103 = vmatpush.xpose.msk.msra.mxu0 %vm52_vm0, %v46_v1 }
  0x13   :  { %104 = vmatmul.msk.f32.vlgmr.msra.gmra.mxu0 %vm52_vm0, %v45_v2 }
  0x90   :  { %v79_v4 = vpop.f32.mrf.mxu0 }
  0x91   :  { %v80_v5 = vadd.f32 %v110_v3, %v79_v4 }
  0x93   :  { %83 = vst.msk [vmem:[#allocation7] sm:$0xff] %vm82_vm1, %v80_v5 }
  0x94   :  { %94 = dma.vmem_to_hbm [thread:$0]  %s90_s25, 128, %s92_s28, [#allocation4]  }
  0x95   :  { %187 = dma.done.wait [#allocation4], 128  }
  0x96   :  { %188 = vsyncadd [#allocation4], 4294967168 }
  0x97   :  { %99 = vsyncpa [#allocation3], 1 }
  0x98   :  { %100 = vsyncpa [#allocation6], 1 }
  0x99   :  { %101 = vsyncpa [#allocation4], 1 }

</bundles_post_ra>
